<compile_context>
chip_gen: v6e
topology: v6e:2x2x1
jax: 0.10.0
libtpu: 0.0.40
codegen_flags: <defaults>
</compile_context>

<pallas_src>
import functools

import numpy as np

import jax
import jax.numpy as jnp
from jax.experimental import pallas as pl
from jax.experimental.pallas import tpu as pltpu

_WINDOW_SIZE = 11
_SIGMA = 1.5
_C1 = 0.01 ** 2
_C2 = 0.03 ** 2
_FACTOR = 0.06 / 1100.0


def _gaussian_1d(window_size=_WINDOW_SIZE, sigma=_SIGMA):
    xs = np.arange(window_size, dtype=np.float64) - window_size // 2
    g = np.exp(-(xs ** 2) / (2.0 * sigma ** 2))
    return g / g.sum()


def _band_matrix(n, g):
    # T[a, b] = g[a - b + r] if |a - b| <= r else 0  (zero-padded 1-D correlation).
    r = len(g) // 2
    idx = np.arange(n)
    off = idx[:, None] - idx[None, :]
    t = np.zeros((n, n), dtype=np.float64)
    m = np.abs(off) <= r
    t[m] = g[off[m] + r]
    return t


def _conv_matrix(h, w, g):
    # K[(i, j), (i', j')] = g[i'-i+r] * g[j'-j+r]  ->  conv_flat = img_flat @ K
    return np.kron(_band_matrix(h, g), _band_matrix(w, g)).astype(np.float32)


def _combined_loss_kernel(x_ref, t_ref, k_ref, s_ref, out_ref, acc_ref, *,
                          n_rows, block_rows, pad, factor, inv_n):
    i = pl.program_id(0)
    last = pl.num_programs(0) - 1

    @pl.when(i == 0)
    def _init():
        acc_ref[...] = jnp.zeros_like(acc_ref)

    x = x_ref[...].astype(jnp.float32)          # (tn, HW)
    t = t_ref[...].astype(jnp.float32)
    kmat = k_ref[...]                           # (HW, HW) bf16, resident across steps
    s = s_ref[...]                              # (1, HW)  f32 exact conv(1) map

    # Per-image centering keeps the bf16 conv operands small so the
    # E[x^2] - mu^2 cancellations remain accurate with bf16 MXU operands.
    a = jnp.mean(x, axis=-1, keepdims=True)     # (tn, 1) f32
    b = jnp.mean(t, axis=-1, keepdims=True)
    xc = x - a
    tc = t - b

    # Five depthwise 11x11 gaussian convs (zero pad 5) == ONE fused bf16 MXU matmul.
    lhs = jnp.concatenate([xc, tc, xc * xc, tc * tc, xc * tc], axis=0)
    res = jnp.dot(lhs.astype(jnp.bfloat16), kmat,
                  preferred_element_type=jnp.float32)        # (5*tn, HW) f32

    tn = block_rows
    u = res[0 * tn:1 * tn]       # conv(xc)
    v = res[1 * tn:2 * tn]       # conv(tc)
    pxx = res[2 * tn:3 * tn]     # conv(xc^2)
    ptt = res[3 * tn:4 * tn]     # conv(tc^2)
    pxt = res[4 * tn:5 * tn]     # conv(xc*tc)

    # Analytic un-centering with the exact f32 support map S = conv(1).
    one_m_s = jnp.float32(1.0) - s
    s_oms = s * one_m_s
    mu1 = u + a * s
    mu2 = v + b * s
    sigma1_sq = pxx - u * u + (2.0 * a) * u * one_m_s + (a * a) * s_oms
    sigma2_sq = ptt - v * v + (2.0 * b) * v * one_m_s + (b * b) * s_oms
    sigma12 = pxt - u * v + (a * v + b * u) * one_m_s + (a * b) * s_oms

    mu1_sq = mu1 * mu1
    mu2_sq = mu2 * mu2
    mu1_mu2 = mu1 * mu2

    c1 = jnp.float32(_C1)
    c2 = jnp.float32(_C2)
    ssim_map = ((2.0 * mu1_mu2 + c1) * (2.0 * sigma12 + c2)) / (
        (mu1_sq + mu2_sq + c1) * (sigma1_sq + sigma2_sq + c2))

    diff = x - t
    # loss = factor*mean(sq_err) + 1 - mean(ssim_map) = 1 + sum(factor*sq_err - ssim)/n
    contrib = jnp.float32(factor) * (diff * diff) - ssim_map

    if pad:
        # Padded (zero) rows would contribute ssim_map == 1; they only exist in the
        # last row tile, so mask only there (cheap unmasked accumulate elsewhere).
        @pl.when(i != last)
        def _acc():
            acc_ref[...] += contrib

        @pl.when(i == last)
        def _acc_masked():
            row_id = i * block_rows + jax.lax.broadcasted_iota(
                jnp.int32, contrib.shape, 0)
            acc_ref[...] += jnp.where(row_id < n_rows, contrib, jnp.float32(0.0))
    else:
        acc_ref[...] += contrib

    @pl.when(i == last)
    def _finalize():
        out_ref[0, 0] = jnp.float32(1.0) + jnp.sum(acc_ref[...]) * jnp.float32(inv_n)


def combined_loss(outputs, targets, *, factor=_FACTOR, block_images=512):
    """CombinedLoss.forward: (0.06/1100) * mse_loss(o, t) + (1 - SSIM(o, t))."""
    assert outputs.shape == targets.shape and outputs.ndim == 4
    b, c, h, w = outputs.shape
    n = b * c
    hw = h * w

    x = outputs.reshape(n, hw)
    t = targets.reshape(n, hw)

    # Row-tile size: a multiple of 8 (sublane constraint), capped by n (rounded up).
    bi = max(8, (int(block_images) // 8) * 8)
    tn = min(bi, pl.cdiv(n, 8) * 8)
    n_padded = pl.cdiv(n, tn) * tn
    pad = n_padded - n
    if pad:
        x = jnp.pad(x, ((0, pad), (0, 0)))
        t = jnp.pad(t, ((0, pad), (0, 0)))

    kmat_f32 = _conv_matrix(h, w, _gaussian_1d())           # (HW, HW) f32, symmetric
    s_map_np = kmat_f32.sum(axis=0, keepdims=True)          # (1, HW) exact conv(1)
    kmat = jnp.asarray(kmat_f32, dtype=jnp.bfloat16)        # bf16 operand for the MXU
    s_map = jnp.asarray(s_map_np, dtype=jnp.float32)

    grid = (n_padded // tn,)
    kernel = functools.partial(
        _combined_loss_kernel,
        n_rows=n, block_rows=tn, pad=int(pad),
        factor=float(factor), inv_n=1.0 / (n * hw))

    itemsize = jnp.dtype(outputs.dtype).itemsize
    cost = pl.CostEstimate(
        flops=int(2 * 5 * n_padded * hw * hw + 40 * n_padded * hw),
        transcendentals=0,
        bytes_accessed=int(2 * n_padded * hw * itemsize + hw * hw * 2 + hw * 4 + 4))

    out = pl.pallas_call(
        kernel,
        out_shape=jax.ShapeDtypeStruct((1, 1), jnp.float32),
        grid_spec=pltpu.PrefetchScalarGridSpec(
            num_scalar_prefetch=0,
            grid=grid,
            in_specs=[
                pl.BlockSpec((tn, hw), lambda i: (i, 0)),
                pl.BlockSpec((tn, hw), lambda i: (i, 0)),
                pl.BlockSpec((hw, hw), lambda i: (0, 0)),   # conv matrix, resident
                pl.BlockSpec((1, hw), lambda i: (0, 0)),    # support map S = conv(1)
            ],
            out_specs=pl.BlockSpec(memory_space=pltpu.MemorySpace.SMEM),
            scratch_shapes=[pltpu.VMEM((tn, hw), jnp.float32)],
        ),
        compiler_params=pltpu.CompilerParams(
            dimension_semantics=("arbitrary",),
            vmem_limit_bytes=48 * 1024 * 1024),
        cost_estimate=cost,
    )(x, t, kmat, s_map)
    return out[0, 0]


def _reference_loss(outputs, targets, factor=_FACTOR):
    """Pure-JAX reference (independent path: lax depthwise conv, f32)."""
    _, c, _, _ = outputs.shape
    g = jnp.asarray(_gaussian_1d(), jnp.float32)
    win = jnp.outer(g, g)
    kern = jnp.broadcast_to(win, (c, 1, _WINDOW_SIZE, _WINDOW_SIZE))
    pad = _WINDOW_SIZE // 2

    def conv(v):
        return jax.lax.conv_general_dilated(
            v, kern, window_strides=(1, 1), padding=((pad, pad), (pad, pad)),
            dimension_numbers=("NCHW", "OIHW", "NCHW"),
            feature_group_count=c, precision=jax.lax.Precision.HIGHEST)

    mu1, mu2 = conv(outputs), conv(targets)
    mu1_sq, mu2_sq, mu1_mu2 = mu1 * mu1, mu2 * mu2, mu1 * mu2
    sigma1_sq = conv(outputs * outputs) - mu1_sq
    sigma2_sq = conv(targets * targets) - mu2_sq
    sigma12 = conv(outputs * targets) - mu1_mu2
    ssim_map = ((2 * mu1_mu2 + _C1) * (2 * sigma12 + _C2)) / (
        (mu1_sq + mu2_sq + _C1) * (sigma1_sq + sigma2_sq + _C2))
    mse = jnp.mean((outputs - targets) ** 2)
    return factor * mse + (1.0 - jnp.mean(ssim_map))


if __name__ == "__main__":
    key = jax.random.PRNGKey(0)
    k1, k2 = jax.random.split(key)

    # Autoencoder-like shapes: (batch, C, H, W) = (2, 4, 16, 16)
    outputs = jax.nn.sigmoid(jax.random.normal(k1, (2, 4, 16, 16), dtype=jnp.float32))
    targets = jax.random.uniform(k2, (2, 4, 16, 16), dtype=jnp.float32)

    loss = jax.block_until_ready(combined_loss(outputs, targets))
    ref = _reference_loss(outputs, targets)

    assert jnp.allclose(loss, ref, rtol=1e-3, atol=1e-3), (loss, ref)
    print("KERNEL_OK")
</pallas_src>

<mosaic_0001>
module attributes {stable_mosaic.version = 11 : i64} {
  func.func @_combined_loss_kernel(%arg0: i32, %arg1: memref<8x256xf32, #tpu.memory_space<vmem>>, %arg2: memref<8x256xf32, #tpu.memory_space<vmem>>, %arg3: memref<256x256xbf16, #tpu.memory_space<vmem>>, %arg4: memref<1x256xf32, #tpu.memory_space<vmem>>, %arg5: memref<1x1xf32, #tpu.memory_space<smem>>, %arg6: memref<8x256xf32, #tpu.memory_space<vmem>>) attributes {dimension_semantics = [#tpu.dimension_semantics<arbitrary>], iteration_bounds = array<i64: 1>, scalar_prefetch = 0 : i64, scratch_operands = 1 : i64, tpu.core_type = #tpu.core_type<tc>, window_params = [{transform_indices = @transform_0, window_bounds = array<i64: 8, 256>}, {transform_indices = @transform_1, window_bounds = array<i64: 8, 256>}, {pipeline_mode = #tpu.pipeline_mode<synchronous>, transform_indices = @transform_2, window_bounds = array<i64: 256, 256>}, {pipeline_mode = #tpu.pipeline_mode<synchronous>, transform_indices = @transform_3, window_bounds = array<i64: 1, 256>}, {transform_indices = @transform_4, window_bounds = array<i64: 1, 1>}]} {
    %c0_i32 = arith.constant 0 : i32
    %0 = arith.cmpi eq, %arg0, %c0_i32 : i32
    %1 = arith.extui %0 : i1 to i32
    %c0_i32_0 = arith.constant 0 : i32
    %2 = arith.cmpi ne, %1, %c0_i32_0 : i32
    scf.if %2 {
      %cst_28 = arith.constant 0.000000e+00 : f32
      %115 = vector.broadcast %cst_28 : f32 to vector<8x256xf32>
      %c0_29 = arith.constant 0 : index
      %c0_30 = arith.constant 0 : index
      %116 = vector.load %arg6[%c0_29, %c0_30] : memref<8x256xf32, #tpu.memory_space<vmem>>, vector<8x256xf32>
      tpu.vector_store %arg6[%c0_29, %c0_30], %115 {strides = array<i32>} : memref<8x256xf32, #tpu.memory_space<vmem>>, vector<8x256xf32>,
    } else {
    }
    %c0 = arith.constant 0 : index
    %c0_1 = arith.constant 0 : index
    %3 = vector.load %arg1[%c0, %c0_1] : memref<8x256xf32, #tpu.memory_space<vmem>>, vector<8x256xf32>
    %c0_2 = arith.constant 0 : index
    %c0_3 = arith.constant 0 : index
    %4 = vector.load %arg2[%c0_2, %c0_3] : memref<8x256xf32, #tpu.memory_space<vmem>>, vector<8x256xf32>
    %c0_4 = arith.constant 0 : index
    %c0_5 = arith.constant 0 : index
    %5 = vector.load %arg3[%c0_4, %c0_5] : memref<256x256xbf16, #tpu.memory_space<vmem>>, vector<256x256xbf16>
    %c0_6 = arith.constant 0 : index
    %c0_7 = arith.constant 0 : index
    %6 = vector.load %arg4[%c0_6, %c0_7] : memref<1x256xf32, #tpu.memory_space<vmem>>, vector<1x256xf32>
    %cst = arith.constant dense<0.000000e+00> : vector<8xf32>
    %7 = vector.multi_reduction <add>, %3, %cst [1] : vector<8x256xf32> to vector<8xf32>
    %8 = vector.shape_cast %7 : vector<8xf32> to vector<8x1xf32>
    %cst_8 = arith.constant 2.560000e+02 : f32
    %9 = vector.broadcast %cst_8 : f32 to vector<8x1xf32>
    %10 = arith.divf %8, %9 : vector<8x1xf32>
    %cst_9 = arith.constant dense<0.000000e+00> : vector<8xf32>
    %11 = vector.multi_reduction <add>, %4, %cst_9 [1] : vector<8x256xf32> to vector<8xf32>
    %12 = vector.shape_cast %11 : vector<8xf32> to vector<8x1xf32>
    %cst_10 = arith.constant 2.560000e+02 : f32
    %13 = vector.broadcast %cst_10 : f32 to vector<8x1xf32>
    %14 = arith.divf %12, %13 : vector<8x1xf32>
    %15 = vector.broadcast %10 : vector<8x1xf32> to vector<8x256xf32>
    %16 = arith.subf %3, %15 : vector<8x256xf32>
    %17 = vector.broadcast %14 : vector<8x1xf32> to vector<8x256xf32>
    %18 = arith.subf %4, %17 : vector<8x256xf32>
    %19 = arith.mulf %16, %16 : vector<8x256xf32>
    %20 = arith.mulf %18, %18 : vector<8x256xf32>
    %21 = arith.mulf %16, %18 : vector<8x256xf32>
    %22 = tpu.concatenate %16, %18, %19, %20, %21 in 0 : vector<8x256xf32>, vector<8x256xf32>, vector<8x256xf32>, vector<8x256xf32>, vector<8x256xf32> -> vector<40x256xf32>
    %23 = arith.truncf %22 : vector<40x256xf32> to vector<40x256xbf16>
    %cst_11 = arith.constant dense<0.000000e+00> : vector<40x256xf32>
    %24 = tpu.matmul %23, %5, %cst_11 {dimension_numbers = #tpu.dot_dimension_numbers<[1], [0], [0], [1], [0, 0, 1, 1], [], []>} : vector<40x256xbf16>, vector<256x256xbf16>, vector<40x256xf32> -> vector<40x256xf32>
    %25 = vector.extract_strided_slice %24 {offsets = [0, 0], sizes = [8, 256], strides = [1, 1]} : vector<40x256xf32> to vector<8x256xf32>
    %26 = vector.extract_strided_slice %24 {offsets = [8, 0], sizes = [8, 256], strides = [1, 1]} : vector<40x256xf32> to vector<8x256xf32>
    %27 = vector.extract_strided_slice %24 {offsets = [16, 0], sizes = [8, 256], strides = [1, 1]} : vector<40x256xf32> to vector<8x256xf32>
    %28 = vector.extract_strided_slice %24 {offsets = [24, 0], sizes = [8, 256], strides = [1, 1]} : vector<40x256xf32> to vector<8x256xf32>
    %29 = vector.extract_strided_slice %24 {offsets = [32, 0], sizes = [8, 256], strides = [1, 1]} : vector<40x256xf32> to vector<8x256xf32>
    %cst_12 = arith.constant 1.000000e+00 : f32
    %30 = vector.broadcast %cst_12 : f32 to vector<1x256xf32>
    %31 = arith.subf %30, %6 : vector<1x256xf32>
    %32 = arith.mulf %6, %31 : vector<1x256xf32>
    %33 = vector.broadcast %10 : vector<8x1xf32> to vector<8x256xf32>
    %34 = vector.broadcast %6 : vector<1x256xf32> to vector<8x256xf32>
    %35 = arith.mulf %33, %34 : vector<8x256xf32>
    %36 = arith.addf %25, %35 : vector<8x256xf32>
    %37 = vector.broadcast %14 : vector<8x1xf32> to vector<8x256xf32>
    %38 = vector.broadcast %6 : vector<1x256xf32> to vector<8x256xf32>
    %39 = arith.mulf %37, %38 : vector<8x256xf32>
    %40 = arith.addf %26, %39 : vector<8x256xf32>
    %41 = arith.mulf %25, %25 : vector<8x256xf32>
    %42 = arith.subf %27, %41 : vector<8x256xf32>
    %cst_13 = arith.constant 2.000000e+00 : f32
    %43 = vector.broadcast %cst_13 : f32 to vector<8x1xf32>
    %44 = arith.mulf %43, %10 : vector<8x1xf32>
    %45 = vector.broadcast %44 : vector<8x1xf32> to vector<8x256xf32>
    %46 = arith.mulf %45, %25 : vector<8x256xf32>
    %47 = vector.broadcast %31 : vector<1x256xf32> to vector<8x256xf32>
    %48 = arith.mulf %46, %47 : vector<8x256xf32>
    %49 = arith.addf %42, %48 : vector<8x256xf32>
    %50 = arith.mulf %10, %10 : vector<8x1xf32>
    %51 = vector.broadcast %50 : vector<8x1xf32> to vector<8x256xf32>
    %52 = vector.broadcast %32 : vector<1x256xf32> to vector<8x256xf32>
    %53 = arith.mulf %51, %52 : vector<8x256xf32>
    %54 = arith.addf %49, %53 : vector<8x256xf32>
    %55 = arith.mulf %26, %26 : vector<8x256xf32>
    %56 = arith.subf %28, %55 : vector<8x256xf32>
    %cst_14 = arith.constant 2.000000e+00 : f32
    %57 = vector.broadcast %cst_14 : f32 to vector<8x1xf32>
    %58 = arith.mulf %57, %14 : vector<8x1xf32>
    %59 = vector.broadcast %58 : vector<8x1xf32> to vector<8x256xf32>
    %60 = arith.mulf %59, %26 : vector<8x256xf32>
    %61 = vector.broadcast %31 : vector<1x256xf32> to vector<8x256xf32>
    %62 = arith.mulf %60, %61 : vector<8x256xf32>
    %63 = arith.addf %56, %62 : vector<8x256xf32>
    %64 = arith.mulf %14, %14 : vector<8x1xf32>
    %65 = vector.broadcast %64 : vector<8x1xf32> to vector<8x256xf32>
    %66 = vector.broadcast %32 : vector<1x256xf32> to vector<8x256xf32>
    %67 = arith.mulf %65, %66 : vector<8x256xf32>
    %68 = arith.addf %63, %67 : vector<8x256xf32>
    %69 = arith.mulf %25, %26 : vector<8x256xf32>
    %70 = arith.subf %29, %69 : vector<8x256xf32>
    %71 = vector.broadcast %10 : vector<8x1xf32> to vector<8x256xf32>
    %72 = arith.mulf %71, %26 : vector<8x256xf32>
    %73 = vector.broadcast %14 : vector<8x1xf32> to vector<8x256xf32>
    %74 = arith.mulf %73, %25 : vector<8x256xf32>
    %75 = arith.addf %72, %74 : vector<8x256xf32>
    %76 = vector.broadcast %31 : vector<1x256xf32> to vector<8x256xf32>
    %77 = arith.mulf %75, %76 : vector<8x256xf32>
    %78 = arith.addf %70, %77 : vector<8x256xf32>
    %79 = arith.mulf %10, %14 : vector<8x1xf32>
    %80 = vector.broadcast %79 : vector<8x1xf32> to vector<8x256xf32>
    %81 = vector.broadcast %32 : vector<1x256xf32> to vector<8x256xf32>
    %82 = arith.mulf %80, %81 : vector<8x256xf32>
    %83 = arith.addf %78, %82 : vector<8x256xf32>
    %84 = arith.mulf %36, %36 : vector<8x256xf32>
    %85 = arith.mulf %40, %40 : vector<8x256xf32>
    %86 = arith.mulf %36, %40 : vector<8x256xf32>
    %cst_15 = arith.constant 2.000000e+00 : f32
    %87 = vector.broadcast %cst_15 : f32 to vector<8x256xf32>
    %88 = arith.mulf %87, %86 : vector<8x256xf32>
    %cst_16 = arith.constant 9.99999974E-5 : f32
    %89 = vector.broadcast %cst_16 : f32 to vector<8x256xf32>
    %90 = arith.addf %88, %89 : vector<8x256xf32>
    %cst_17 = arith.constant 2.000000e+00 : f32
    %91 = vector.broadcast %cst_17 : f32 to vector<8x256xf32>
    %92 = arith.mulf %91, %83 : vector<8x256xf32>
    %cst_18 = arith.constant 8.99999984E-4 : f32
    %93 = vector.broadcast %cst_18 : f32 to vector<8x256xf32>
    %94 = arith.addf %92, %93 : vector<8x256xf32>
    %95 = arith.mulf %90, %94 : vector<8x256xf32>
    %96 = arith.addf %84, %85 : vector<8x256xf32>
    %cst_19 = arith.constant 9.99999974E-5 : f32
    %97 = vector.broadcast %cst_19 : f32 to vector<8x256xf32>
    %98 = arith.addf %96, %97 : vector<8x256xf32>
    %99 = arith.addf %54, %68 : vector<8x256xf32>
    %cst_20 = arith.constant 8.99999984E-4 : f32
    %100 = vector.broadcast %cst_20 : f32 to vector<8x256xf32>
    %101 = arith.addf %99, %100 : vector<8x256xf32>
    %102 = arith.mulf %98, %101 : vector<8x256xf32>
    %103 = arith.divf %95, %102 : vector<8x256xf32>
    %104 = arith.subf %3, %4 : vector<8x256xf32>
    %105 = arith.mulf %104, %104 : vector<8x256xf32>
    %cst_21 = arith.constant 5.45454532E-5 : f32
    %106 = vector.broadcast %cst_21 : f32 to vector<8x256xf32>
    %107 = arith.mulf %106, %105 : vector<8x256xf32>
    %108 = arith.subf %107, %103 : vector<8x256xf32>
    %c0_22 = arith.constant 0 : index
    %c0_23 = arith.constant 0 : index
    %109 = vector.load %arg6[%c0_22, %c0_23] : memref<8x256xf32, #tpu.memory_space<vmem>>, vector<8x256xf32>
    %110 = arith.addf %109, %108 : vector<8x256xf32>
    %c0_24 = arith.constant 0 : index
    %c0_25 = arith.constant 0 : index
    %111 = vector.load %arg6[%c0_24, %c0_25] : memref<8x256xf32, #tpu.memory_space<vmem>>, vector<8x256xf32>
    tpu.vector_store %arg6[%c0_24, %c0_25], %110 {strides = array<i32>} : memref<8x256xf32, #tpu.memory_space<vmem>>, vector<8x256xf32>,
    %c0_i32_26 = arith.constant 0 : i32
    %112 = arith.cmpi eq, %arg0, %c0_i32_26 : i32
    %113 = arith.extui %112 : i1 to i32
    %c0_i32_27 = arith.constant 0 : i32
    %114 = arith.cmpi ne, %113, %c0_i32_27 : i32
    scf.if %114 {
      %c0_28 = arith.constant 0 : index
      %c0_29 = arith.constant 0 : index
      %115 = vector.load %arg6[%c0_28, %c0_29] : memref<8x256xf32, #tpu.memory_space<vmem>>, vector<8x256xf32>
      %116 = vector.shape_cast %115 : vector<8x256xf32> to vector<1x8x256xf32>
      %cst_30 = arith.constant dense<0.000000e+00> : vector<1xf32>
      %117 = vector.multi_reduction <add>, %116, %cst_30 [1, 2] : vector<1x8x256xf32> to vector<1xf32>
      %118 = vector.shape_cast %117 : vector<1xf32> to vector<1x1x1xf32>
      %119 = vector.extract %118[0, 0, 0] : f32 from vector<1x1x1xf32>
      %cst_31 = arith.constant 4.8828125E-4 : f32
      %120 = arith.mulf %119, %cst_31 : f32
      %cst_32 = arith.constant 1.000000e+00 : f32
      %121 = arith.addf %cst_32, %120 : f32
      %c0_33 = arith.constant 0 : index
      %c0_34 = arith.constant 0 : index
      %122 = memref.load %arg5[%c0_33, %c0_34] : memref<1x1xf32, #tpu.memory_space<smem>>
      memref.store %121, %arg5[%c0_33, %c0_34] : memref<1x1xf32, #tpu.memory_space<smem>>
    } else {
    }
    return
  }
  func.func @transform_0(%arg0: i32) -> (i32, i32) {
    %c0_i32 = arith.constant 0 : i32
    %c0_i32_0 = arith.constant 0 : i32
    return %arg0, %c0_i32 : i32, i32
  }
  func.func @transform_1(%arg0: i32) -> (i32, i32) {
    %c0_i32 = arith.constant 0 : i32
    %c0_i32_0 = arith.constant 0 : i32
    return %arg0, %c0_i32 : i32, i32
  }
  func.func @transform_2(%arg0: i32) -> (i32, i32) {
    %c0_i32 = arith.constant 0 : i32
    %c0_i32_0 = arith.constant 0 : i32
    %c0_i32_1 = arith.constant 0 : i32
    return %c0_i32, %c0_i32_0 : i32, i32
  }
  func.func @transform_3(%arg0: i32) -> (i32, i32) {
    %c0_i32 = arith.constant 0 : i32
    %c0_i32_0 = arith.constant 0 : i32
    %c0_i32_1 = arith.constant 0 : i32
    return %c0_i32, %c0_i32_0 : i32, i32
  }
  func.func @transform_4(%arg0: i32) -> (i32, i32) {
    %c0_i32 = arith.constant 0 : i32
    %c0_i32_0 = arith.constant 0 : i32
    %c0_i32_1 = arith.constant 0 : i32
    return %c0_i32, %c0_i32_0 : i32, i32
  }
}

</mosaic_0001>

<bundles_post_ra>
// kernel: tpu_custom_call.1
= control target key start
LH: loop header
LB: loop body
LE: loop exit
PB: predicated region body
PF: predicated region fallthrough
CT: control target
= control target key end

     0   :  { %9 = vsyncpa [#allocation4], 0  ;;  %s834_s0 = inlined_call_operand.hbm [shape: f32[8,256], index: 0, kind: input, shape index: {}]   ;;  %s835_s1 = inlined_call_operand.hbm [shape: f32[8,256], index: 1, kind: input, shape index: {}]   ;;  %s836_s2 = inlined_call_operand.hbm [shape: bf16[256,256], index: 2, kind: input, shape index: {}]   ;;  %s837_s3 = inlined_call_operand.vmem [shape: f32[1,256], index: 3, kind: input, shape index: {}]   ;;  %s838_s4 = inlined_call_operand.hbm [shape: f32[1,1], index: 4, kind: output, shape index: {}]  }
   0x1   :  { %10 = vsyncpa [#allocation7], 0 }
   0x2   :  { %11 = vsyncpa [#allocation5], 0  ;;  %s714_s15 = smov [#allocation6]   ;;  %s715_s17 = smov [#allocation3]  }
   0x3   :  { %s28_s16 = sshll.u32 %s714_s15, 4  ;;  %s18_s18 = sshll.u32 %s715_s17, 4  ;;  %s29_s16 = int_to_ptr.vmem [resolvable:$true] %s28_s16  ;;  %s19_s18 = int_to_ptr.vmem [resolvable:$true] %s18_s18 }
   0x4   :  { %s648_s19 = scalar_lea.vmem %s29_s16, 256  ;;  %p653_p1 = scmp.lt.s32.totalorder %s29_s16, %s29_s16 }
   0x5   :  { %p649_p0 = scmp.ne.s32.totalorder %s29_s16, %s648_s19  ;;  %p654_p2 = scmp.lt.s32.totalorder %s648_s19, %s648_s19 }
   0x7   :  { %p655_p3 = por %p654_p2, %p653_p1 }
   0x9   :  { %p656_p4 = pnand %p655_p3, %p649_p0 }
   0xb   :  { %659 = shalt.err (!%p656_p4)
}
   0xc   :  { %31 = dma.hbm_to_vmem [thread:$0]  %s835_s1, 256, %s29_s16, [#allocation7]  }
   0xd   :  { %s668_s22 = scalar_lea.vmem %s19_s18, 256  ;;  %p673_p6 = scmp.lt.s32.totalorder %s19_s18, %s19_s18 }
   0xe   :  { %p669_p5 = scmp.ne.s32.totalorder %s19_s18, %s668_s22  ;;  %p674_p7 = scmp.lt.s32.totalorder %s668_s22, %s668_s22 }
  0x10   :  { %p675_p8 = por %p674_p7, %p673_p6 }
  0x12   :  { %p676_p9 = pnand %p675_p8, %p669_p5 }
  0x14   :  { %679 = shalt.err (!%p676_p9)
}
  0x15   :  { %21 = dma.hbm_to_vmem [thread:$0]  %s834_s0, 256, %s19_s18, [#allocation4]  }
  0x16   :  { %s716_s25 = smov [#allocation8]  }
  0x17   :  { %s37_s26 = sshll.u32 %s716_s25, 4  ;;  %s38_s26 = int_to_ptr.vmem [resolvable:$true] %s37_s26 }
  0x18   :  { %s688_s27 = scalar_lea.vmem %s38_s26, 4096  ;;  %p693_p11 = scmp.lt.s32.totalorder %s38_s26, %s38_s26 }
  0x19   :  { %p689_p10 = scmp.ne.s32.totalorder %s38_s26, %s688_s27  ;;  %p694_p12 = scmp.lt.s32.totalorder %s688_s27, %s688_s27 }
  0x1b   :  { %p695_p13 = por %p694_p12, %p693_p11 }
  0x1d   :  { %p696_p0 = pnand %p695_p13, %p689_p10 }
  0x1f   :  { %699 = shalt.err (!%p696_p0)
}
  0x20   :  { %s717_s1 = smov 128   ;;  %s718_s28 = smov 8  }
  0x21   :  { %43 = dma.hbm_to_vmem [thread:$0]  %s836_s2, 4096, %s38_s26, [#allocation7], %s717_s1, %s717_s1, %s718_s28  }
  0x22   :  { %708 = dma.done.wait [#allocation4], 256  }
  0x23   :  { %709 = vsyncadd [#allocation4], 4294967040 }
  0x24   :  { %710 = dma.done.wait [#allocation7], 4352  }
  0x25   :  { %711 = vsyncadd [#allocation7], 4294962944  ;;  %v754_v0 = vld [vmem:[#allocation3] sm:$0xff]  ;;  %v756_v1 = vld [vmem:[#allocation3 + $0x8] sm:$0xff]  ;;  %v347_v58 = vlaneseq  ;;  %s719_s7 = smov [#allocation9]  }
  0x26   :  { %v758_v2 = vld [vmem:[#allocation6] sm:$0xff]  ;;  %v98_v3 = vadd.f32 %v756_v1, %v754_v0  ;;  %v762_v4 = vld [vmem:[#allocation6 + $0x8] sm:$0xff]  ;;  %v591_v8 = vld [vmem:[#allocation8 + $0x64] ss:$8 sps:$4 sm:$0xff]  }
  0x27   :  { %v588_v5 = vld [vmem:[#allocation8 + $0x74] ss:$8 sps:$4 sm:$0xff]   ;;  %v590_v6 = vld [vmem:[#allocation8 + $0x70] ss:$8 sps:$4 sm:$0xff]   ;;  %v103_v7 = vadd.f32 %v762_v4, %v758_v2  ;;  %v593_v9 = vld [vmem:[#allocation8 + $0x60] ss:$8 sps:$4 sm:$0xff]  }
  0x28   :  { %99 = vadd.xlane.f32.xlu0 %v98_v3  ;;  %283 = vmatprep.subr.bf16.mxu0 %v588_v5  ;;  %v594_v10 = vld [vmem:[#allocation8 + $0x54] ss:$8 sps:$4 sm:$0xff]   ;;  %v596_v11 = vld [vmem:[#allocation8 + $0x50] ss:$8 sps:$4 sm:$0xff]   ;;  %v597_v12 = vld [vmem:[#allocation8 + $0x44] ss:$8 sps:$4 sm:$0xff]  }
  0x29   :  { %548 = vmatprep.subr.bf16.mxu1 %v588_v5  ;;  %284 = vmatpush1.bf16.msra.mxu0 %v590_v6  ;;  %v599_v13 = vld [vmem:[#allocation8 + $0x40] ss:$8 sps:$4 sm:$0xff]   ;;  %v600_v14 = vld [vmem:[#allocation8 + $0x34] ss:$8 sps:$4 sm:$0xff]   ;;  %v602_v15 = vld [vmem:[#allocation8 + $0x30] ss:$8 sps:$4 sm:$0xff]  }
  0x2a   :  { %564 = vmatpush1.bf16.msra.mxu1 %v590_v6  ;;  %285 = vmatprep.subr.bf16.mxu0 %v591_v8  ;;  %v603_v16 = vld [vmem:[#allocation8 + $0x24] ss:$8 sps:$4 sm:$0xff]   ;;  %v605_v17 = vld [vmem:[#allocation8 + $0x20] ss:$8 sps:$4 sm:$0xff]   ;;  %v606_v18 = vld [vmem:[#allocation8 + $0x14] ss:$8 sps:$4 sm:$0xff]  }
  0x2b   :  { %549 = vmatprep.subr.bf16.mxu1 %v591_v8  ;;  %v608_v19 = vld [vmem:[#allocation8 + $0x10] ss:$8 sps:$4 sm:$0xff]   ;;  %v609_v20 = vld [vmem:[#allocation8 + $0x4] ss:$8 sps:$4 sm:$0xff]   ;;  %v611_v21 = vld [vmem:[#allocation8] ss:$8 sps:$4 sm:$0xff]  }
  0x2c   :  { %104 = vadd.xlane.f32.xlu0 %v103_v7  ;;  %v612_v22 = vld [vmem:[#allocation8 + $0xf4] ss:$8 sps:$4 sm:$0xff]   ;;  %v614_v23 = vld [vmem:[#allocation8 + $0xf0] ss:$8 sps:$4 sm:$0xff]   ;;  %v615_v24 = vld [vmem:[#allocation8 + $0xe4] ss:$8 sps:$4 sm:$0xff]  }
  0x2d   :  { %286 = vmatpush1.bf16.msra.mxu0 %v593_v9  ;;  %v617_v25 = vld [vmem:[#allocation8 + $0xe0] ss:$8 sps:$4 sm:$0xff]   ;;  %v618_v26 = vld [vmem:[#allocation8 + $0xd4] ss:$8 sps:$4 sm:$0xff]   ;;  %v620_v27 = vld [vmem:[#allocation8 + $0xd0] ss:$8 sps:$4 sm:$0xff]  }
  0x2e   :  { %565 = vmatpush1.bf16.msra.mxu1 %v593_v9  ;;  %287 = vmatprep.subr.bf16.mxu0 %v594_v10  ;;  %v621_v28 = vld [vmem:[#allocation8 + $0xc4] ss:$8 sps:$4 sm:$0xff]   ;;  %v623_v29 = vld [vmem:[#allocation8 + $0xc0] ss:$8 sps:$4 sm:$0xff]   ;;  %v624_v30 = vld [vmem:[#allocation8 + $0xb4] ss:$8 sps:$4 sm:$0xff]  }
  0x2f   :  { %550 = vmatprep.subr.bf16.mxu1 %v594_v10  ;;  %v626_v31 = vld [vmem:[#allocation8 + $0xb0] ss:$8 sps:$4 sm:$0xff]   ;;  %v627_v32 = vld [vmem:[#allocation8 + $0xa4] ss:$8 sps:$4 sm:$0xff]   ;;  %v629_v33 = vld [vmem:[#allocation8 + $0xa0] ss:$8 sps:$4 sm:$0xff]  }
  0x30   :  { %v630_v34 = vld [vmem:[#allocation8 + $0x94] ss:$8 sps:$4 sm:$0xff]   ;;  %v632_v35 = vld [vmem:[#allocation8 + $0x90] ss:$8 sps:$4 sm:$0xff]   ;;  %v633_v36 = vld [vmem:[#allocation8 + $0x84] ss:$8 sps:$4 sm:$0xff]  }
  0x31   :  { %288 = vmatpush1.bf16.msra.mxu0 %v596_v11  ;;  %v635_v37 = vld [vmem:[#allocation8 + $0x80] ss:$8 sps:$4 sm:$0xff]   ;;  %v348_v60 = vshrl.u32 %v347_v58, 7 }
  0x32   :  { %566 = vmatpush1.bf16.msra.mxu1 %v596_v11  ;;  %289 = vmatprep.subr.bf16.mxu0 %v597_v12  ;;  %v97_v59 = vld [vmem:[%s837_s3] sm:$0x3] }
  0x33   :  { %551 = vmatprep.subr.bf16.mxu1 %v597_v12  ;;  %v344_v61 = vsub.f32 1.0, %v97_v59  ;;  %v349_v62 = vsub.s32 0, %v348_v60  ;;  %v353_v63 = vsub.s32 1, %v348_v60 }
  0x35   :  { %290 = vmatpush1.bf16.msra.mxu0 %v599_v13  ;;  %v345_v3 = vmul.f32 %v344_v61, %v97_v59  ;;  %v350_v5 = vrot.slane %v97_v59, %v349_v62  ;;  %v354_v6 = vrot.slane %v97_v59, %v353_v63  ;;  %v788_v12 = vrot.slane %v344_v61, %v349_v62 }
  0x36   :  { %567 = vmatpush1.bf16.msra.mxu1 %v599_v13  ;;  %291 = vmatprep.subr.bf16.mxu0 %v600_v14 }
  0x37   :  { %552 = vmatprep.subr.bf16.mxu1 %v600_v14  ;;  %v783_v8 = vrot.slane %v345_v3, %v349_v62  ;;  %v786_v10 = vrot.slane %v345_v3, %v353_v63 }
  0x39   :  { %292 = vmatpush1.bf16.msra.mxu0 %v602_v15 }
  0x3a   :  { %568 = vmatpush1.bf16.msra.mxu1 %v602_v15  ;;  %293 = vmatprep.subr.bf16.mxu0 %v603_v16 }
  0x3b   :  { %553 = vmatprep.subr.bf16.mxu1 %v603_v16 }
  0x3d   :  { %294 = vmatpush1.bf16.msra.mxu0 %v605_v17 }
  0x3e   :  { %569 = vmatpush1.bf16.msra.mxu1 %v605_v17  ;;  %295 = vmatprep.subr.bf16.mxu0 %v606_v18 }
  0x3f   :  { %554 = vmatprep.subr.bf16.mxu1 %v606_v18 }
  0x41   :  { %296 = vmatpush1.bf16.msra.mxu0 %v608_v19 }
  0x42   :  { %570 = vmatpush1.bf16.msra.mxu1 %v608_v19  ;;  %297 = vmatprep.subr.bf16.mxu0 %v609_v20 }
  0x43   :  { %555 = vmatprep.subr.bf16.mxu1 %v609_v20 }
  0x45   :  { %298 = vmatpush1.bf16.msra.mxu0 %v611_v21 }
  0x46   :  { %571 = vmatpush1.bf16.msra.mxu1 %v611_v21  ;;  %299 = vmatprep.subr.bf16.mxu0 %v612_v22  ;;  %v795_v21 = vrot.slane %v344_v61, %v353_v63 }
  0x47   :  { %556 = vmatprep.subr.bf16.mxu1 %v612_v22 }
  0x49   :  { %300 = vmatpush2.bf16.msra.mxu0 %v614_v23 }
  0x4a   :  { %572 = vmatpush2.bf16.msra.mxu1 %v614_v23  ;;  %301 = vmatprep.subr.bf16.mxu0 %v615_v24 }
  0x4b   :  { %557 = vmatprep.subr.bf16.mxu1 %v615_v24 }
  0x4d   :  { %302 = vmatpush2.bf16.msra.mxu0 %v617_v25 }
  0x4e   :  { %573 = vmatpush2.bf16.msra.mxu1 %v617_v25  ;;  %303 = vmatprep.subr.bf16.mxu0 %v618_v26 }
  0x4f   :  { %558 = vmatprep.subr.bf16.mxu1 %v618_v26 }
  0x51   :  { %304 = vmatpush2.bf16.msra.mxu0 %v620_v27 }
  0x52   :  { %574 = vmatpush2.bf16.msra.mxu1 %v620_v27  ;;  %305 = vmatprep.subr.bf16.mxu0 %v621_v28 }
  0x53   :  { %559 = vmatprep.subr.bf16.mxu1 %v621_v28 }
  0x55   :  { %306 = vmatpush2.bf16.msra.mxu0 %v623_v29 }
  0x56   :  { %575 = vmatpush2.bf16.msra.mxu1 %v623_v29  ;;  %307 = vmatprep.subr.bf16.mxu0 %v624_v30 }
  0x57   :  { %560 = vmatprep.subr.bf16.mxu1 %v624_v30 }
  0x59   :  { %308 = vmatpush2.bf16.msra.mxu0 %v626_v31 }
  0x5a   :  { %576 = vmatpush2.bf16.msra.mxu1 %v626_v31  ;;  %309 = vmatprep.subr.bf16.mxu0 %v627_v32 }
  0x5b   :  { %561 = vmatprep.subr.bf16.mxu1 %v627_v32 }
  0x5d   :  { %310 = vmatpush2.bf16.msra.mxu0 %v629_v33 }
  0x5e   :  { %577 = vmatpush2.bf16.msra.mxu1 %v629_v33  ;;  %311 = vmatprep.subr.bf16.mxu0 %v630_v34 }
  0x5f   :  { %562 = vmatprep.subr.bf16.mxu1 %v630_v34 }
  0x61   :  { %312 = vmatpush2.bf16.msra.mxu0 %v632_v35 }
  0x62   :  { %578 = vmatpush2.bf16.msra.mxu1 %v632_v35  ;;  %313 = vmatprep.subr.bf16.mxu0 %v633_v36 }
  0x63   :  { %563 = vmatprep.subr.bf16.mxu1 %v633_v36 }
  0x65   :  { %314 = vmatpush2.bf16.msra.mxu0 %v635_v37 }
  0x66   :  { %579 = vmatpush2.bf16.msra.mxu1 %v635_v37 }
  0xb1   :  { %v100_v38 = vpop.xlane.xlu0 %99 }
  0xb2   :  { %v766_v39 = vmul.f32 0.00390625, %v100_v38 }
  0xb4   :  { %v108_v41 = vsub.f32 %v756_v1, %v766_v39  ;;  %v107_v42 = vsub.f32 %v754_v0, %v766_v39  ;;  %v387_v7 = vmul.f32 %v766_v39, %v766_v39  ;;  %v369_v9 = vmul.f32 2.0, %v766_v39 }
  0xb5   :  { %v105_v40 = vpop.xlane.xlu0 %104  ;;  %v357_v16 = vmul.f32 %v350_v5, %v766_v39  ;;  %v358_v18 = vmul.f32 %v354_v6, %v766_v39 }
  0xb6   :  { %v772_v43 = vmul.f32 0.00390625, %v105_v40  ;;  %v112_v46 = vmul.f32 %v108_v41, %v108_v41  ;;  %v111_v47 = vmul.f32 %v107_v42, %v107_v42  ;;  %v399_v20 = vmul.f32 %v783_v8, %v387_v7 }
  0xb7   :  { %v400_v23 = vmul.f32 %v786_v10, %v387_v7 }
  0xb8   :  { %v110_v44 = vsub.f32 %v762_v4, %v772_v43  ;;  %v109_v45 = vsub.f32 %v758_v2, %v772_v43  ;;  %v414_v15 = vmul.f32 %v772_v43, %v772_v43  ;;  %v361_v22 = vmul.f32 %v350_v5, %v772_v43 }
  0xb9   :  { %v362_v24 = vmul.f32 %v354_v6, %v772_v43  ;;  %v407_v25 = vmul.f32 2.0, %v772_v43 }
  0xba   :  { %v118_v48 = vpack.c.bf16 %v110_v44, %v108_v41  ;;  %v117_v49 = vpack.c.bf16 %v109_v45, %v107_v42  ;;  %v114_v50 = vmul.f32 %v110_v44, %v110_v44  ;;  %v113_v51 = vmul.f32 %v109_v45, %v109_v45 }
  0xbb   :  { %v116_v52 = vmul.f32 %v110_v44, %v108_v41  ;;  %v115_v56 = vmul.f32 %v109_v45, %v107_v42  ;;  %v415_v35 = vmul.f32 %v414_v15, %v783_v8  ;;  %v416_v42 = vmul.f32 %v414_v15, %v786_v10 }
  0xbc   :  { %315 = vmatprep.mubr.bf16.mxu0 %v118_v48  ;;  %v120_v53 = vpack.c.bf16 %v114_v50, %v112_v46  ;;  %v119_v54 = vpack.c.bf16 %v113_v51, %v111_v47 }
  0xbd   :  { %316 = vmatmul.mubr.bf16.vlgmr.msra.gmra.mxu0 %v117_v49  ;;  %v122_v55 = vpack.c.bf16 %v116_v52, %v116_v52  ;;  %v121_v57 = vpack.c.bf16 %v115_v56, %v115_v56 }
  0xbe   :  { %325 = vmatprep.mubr.bf16.mxu1 %v120_v53 }
  0xbf   :  { %326 = vmatmul.mubr.bf16.vlgmr.msra.gmra.mxu1 %v119_v54 }
  0xc0   :  { %335 = vmatprep.mubr.bf16.mxu1 %v122_v55 }
  0xc7   :  { %336 = vmatmul.mubr.bf16.gmra.mxu1 %v121_v57 }
 0x17d   :  { %v317_v11 = vpop.f32.mrf.mxu0 }
 0x17e   :  { %v365_v13 = vmul.f32 %v317_v11, %v317_v11  ;;  %v370_v14 = vmul.f32 %v369_v9, %v317_v11  ;;  %v802_v32 = vadd.f32 %v357_v16, %v317_v11  ;;  %v425_v47 = vmul.f32 %v317_v11, %v772_v43 }
 0x17f   :  { %v319_v17 = vpop.f32.mrf.mxu0  ;;  %v327_v19 = vpop.f32.mrf.mxu1 }
 0x180   :  { %v367_v26 = vsub.f32 %v327_v19, %v365_v13  ;;  %v383_v27 = vmul.f32 %v788_v12, %v370_v14  ;;  %v366_v30 = vmul.f32 %v319_v17, %v319_v17  ;;  %v371_v31 = vmul.f32 %v369_v9, %v319_v17 }
 0x181   :  { %v321_v28 = vpop.f32.mrf.mxu0  ;;  %v329_v29 = vpop.f32.mrf.mxu1  ;;  %v360_v44 = vadd.f32 %v358_v18, %v319_v17  ;;  %v438_v53 = vmul.f32 %v802_v32, %v802_v32  ;;  %v426_v56 = vmul.f32 %v319_v17, %v772_v43 }
 0x182   :  { %v804_v33 = vadd.f32 %v361_v22, %v321_v28  ;;  %v403_v34 = vmul.f32 %v321_v28, %v321_v28  ;;  %v368_v36 = vsub.f32 %v329_v29, %v366_v30  ;;  %v384_v37 = vmul.f32 %v795_v21, %v371_v31 }
 0x183   :  { %v323_v38 = vpop.f32.mrf.mxu0  ;;  %v331_v40 = vpop.f32.mrf.mxu1  ;;  %v408_v41 = vmul.f32 %v407_v25, %v321_v28  ;;  %v385_v48 = vadd.f32 %v383_v27, %v367_v26  ;;  %v423_v61 = vmul.f32 %v321_v28, %v766_v39  ;;  %v439_v62 = vmul.f32 %v360_v44, %v360_v44 }
 0x184   :  { %v364_v45 = vadd.f32 %v362_v24, %v323_v38  ;;  %v409_v46 = vmul.f32 %v407_v25, %v323_v38  ;;  %v440_v49 = vmul.f32 %v804_v33, %v804_v33  ;;  %v405_v50 = vsub.f32 %v331_v40, %v403_v34 }
 0x185   :  { %v410_v51 = vmul.f32 %v408_v41, %v788_v12  ;;  %v333_v52 = vpop.f32.mrf.mxu1  ;;  %v424_v54 = vmul.f32 %v323_v38, %v766_v39  ;;  %v404_v55 = vmul.f32 %v323_v38, %v323_v38  ;;  %v386_v57 = vadd.f32 %v384_v37, %v368_v36 }
 0x186   :  { %v411_v59 = vmul.f32 %v409_v46, %v795_v21  ;;  %v441_v63 = vmul.f32 %v364_v45, %v364_v45  ;;  %v419_v5 = vmul.f32 %v321_v28, %v317_v11  ;;  %v401_v6 = vadd.f32 %v399_v20, %v385_v48 }
 0x187   :  { %v412_v58 = vadd.f32 %v410_v51, %v405_v50  ;;  %v337_v60 = vpop.f32.mrf.mxu1  ;;  %v406_v3 = vsub.f32 %v333_v52, %v404_v55  ;;  %v454_v9 = vadd.f32 %v440_v49, %v438_v53  ;;  %v427_v13 = vadd.f32 %v425_v47, %v423_v61 }
 0x188   :  { %v421_v16 = vsub.f32 %v337_v60, %v419_v5  ;;  %v420_v18 = vmul.f32 %v323_v38, %v319_v17  ;;  %v428_v19 = vadd.f32 %v426_v56, %v424_v54  ;;  %v402_v22 = vadd.f32 %v400_v23, %v386_v57 }
 0x189   :  { %v417_v7 = vadd.f32 %v415_v35, %v412_v58  ;;  %v339_v14 = vpop.f32.mrf.mxu1  ;;  %v413_v15 = vadd.f32 %v411_v59, %v406_v3  ;;  %v433_v25 = vmul.f32 %v772_v43, %v766_v39  ;;  %v455_v27 = vadd.f32 %v441_v63, %v439_v62 }
 0x18a   :  { %v429_v30 = vmul.f32 %v427_v13, %v788_v12  ;;  %v422_v11 = vsub.f32 %v339_v14, %v420_v18  ;;  %v456_v20 = vadd.f32 0.0001, %v454_v9  ;;  %v430_v36 = vmul.f32 %v428_v19, %v795_v21 }
 0x18b   :  { %v458_v24 = vadd.f32 %v417_v7, %v401_v6  ;;  %v341_v26 = vpop.f32.mrf.mxu1  ;;  %v418_v29 = vadd.f32 %v416_v42, %v413_v15  ;;  %v457_v37 = vadd.f32 0.0001, %v455_v27  ;;  %v434_v38 = vmul.f32 %v433_v25, %v783_v8 }
 0x18c   :  { %v431_v35 = vadd.f32 %v429_v30, %v421_v16  ;;  %v432_v40 = vadd.f32 %v430_v36, %v422_v11  ;;  %v435_v41 = vmul.f32 %v433_v25, %v786_v10  ;;  %v442_v42 = vmul.f32 %v804_v33, %v802_v32 }
 0x18d   :  { %v460_v28 = vadd.f32 0.0009, %v458_v24  ;;  %v342_v31 = vpop.f32.mrf.mxu1  ;;  %v459_v34 = vadd.f32 %v418_v29, %v402_v22  ;;  %v443_v46 = vmul.f32 %v364_v45, %v360_v44  ;;  %v468_v49 = vsub.f32 %v754_v0, %v758_v2 }
 0x18e   :  { %v436_v43 = vadd.f32 %v434_v38, %v431_v35  ;;  %v437_v12 = vadd.f32 %v435_v41, %v432_v40  ;;  %v444_v21 = vmul.f32 2.0, %v442_v42  ;;  %v469_v8 = vsub.f32 %v756_v1, %v762_v4 }
 0x18f   :  { %v462_v17 = vmul.f32 %v460_v28, %v456_v20  ;;  %v461_v23 = vadd.f32 0.0009, %v459_v34  ;;  %v445_v50 = vmul.f32 2.0, %v443_v46  ;;  %v470_v10 = vmul.f32 %v468_v49, %v468_v49 }
 0x190   :  { %v448_v47 = vmul.f32 2.0, %v436_v43  ;;  %v449_v48 = vmul.f32 2.0, %v437_v12  ;;  %v446_v53 = vadd.f32 0.0001, %v444_v21  ;;  %v471_v54 = vmul.f32 %v469_v8, %v469_v8 }
 0x191   :  { %636 = vrcp.f32 %v462_v17  ;;  %v463_v39 = vmul.f32 %v461_v23, %v457_v37  ;;  %v447_v56 = vadd.f32 0.0001, %v445_v50  ;;  %v472_v44 = vmul.f32 5.4545453e-05, %v470_v10 }
 0x192   :  { %v450_v51 = vadd.f32 0.0009, %v448_v47  ;;  %v451_v52 = vadd.f32 0.0009, %v449_v48  ;;  %v473_v45 = vmul.f32 5.4545453e-05, %v471_v54 }
 0x193   :  { %638 = vrcp.f32 %v463_v39 }
 0x194   :  { %v452_v57 = vmul.f32 %v450_v51, %v446_v53  ;;  %v453_v32 = vmul.f32 %v451_v52, %v447_v56 }
 0x19e   :  { %v637_v55 = vpop.eup %636 }
 0x19f   :  { %v465_v33 = vmul.f32 %v637_v55, %v452_v57 }
 0x1a0   :  { %v639_v58 = vpop.eup %638 }
 0x1a1   :  { %v467_v59 = vmul.f32 %v639_v58, %v453_v32  ;;  %v474_v60 = vsub.f32 %v472_v44, %v465_v33 }
 0x1a3   :  { %v475_v0 = vsub.f32 %v473_v45, %v467_v59 }
 0x1a5   :  { %v487_v2 = vadd.f32 %v475_v0, %v474_v60 }
 0x1a7   :  { %488 = vadd.xlane.f32.xlu1 %v487_v2 }
 0x230   :  { %v489_v1 = vpop.xlane.xlu1 %488 }
 0x231   :  { %v490_v4 = vrot.slane %v489_v1, 4 }
 0x233   :  { %v491_v61 = vadd.f32 %v490_v4, %v489_v1 }
 0x235   :  { %v492_v62 = vrot.slane %v491_v61, 2 }
 0x237   :  { %v493_v63 = vadd.f32 %v492_v62, %v491_v61 }
 0x239   :  { %v494_v3 = vrot.slane %v493_v63, 1 }
 0x23b   :  { %v495_v5 = vadd.f32 %v494_v3, %v493_v63 }
 0x23d   :  { %580 = vpush %v495_v5 }
 0x26e   :  { %s581_s3 = spop %580 }
 0x26f   :  { %s497_s5 = smul.f32 0.00048828125, %s581_s3 }
 0x271   :  { %s498_s6 = sadd.f32 1.0, %s497_s5 }
 0x273   :  { %500 = sst [smem:[#allocation9]] %s498_s6 }
 0x274   :  { %508 = dma.smem_to_hbm %s719_s7, 16, %s838_s4, [#allocation5]  }
 0x275   :  { %712 = dma.done.wait [#allocation5], 16  }
 0x276   :  { %713 = vsyncadd [#allocation5], 4294967280 }
 0x277   :  { %512 = sfence }
 0x278   :  { %513 = vsyncpa [#allocation4], 1 }
 0x279   :  { %514 = vsyncpa [#allocation7], 1 }
 0x27a   :  { %515 = vsyncpa [#allocation5], 1 }

</bundles_post_ra>
